<compile_context>
chip_gen: v7x
topology: tpu7x:2x2x1
jax: 0.10.0
libtpu: 0.0.40
codegen_flags: <defaults>
</compile_context>

<pallas_src>
import math

import jax
import jax.numpy as jnp
import numpy as np
from jax.experimental import pallas as pl
from jax.experimental.pallas import tpu as pltpu


def _round_up(x, m):
    return (x + m - 1) // m * m


def _tiles(n):
    """Row tile (<=256), K tile (<=1024), padded node count."""
    n128 = _round_up(n, 128)
    tm = min(256, n128)
    tk = min(1024, n128)
    lcm = tm * tk // math.gcd(tm, tk)
    n_p = _round_up(n, lcm)
    # v7x has 2 TensorCores; keep >=2 "parallel" row tiles so both get work.
    if n_p // tm < 2:
        n_p = 2 * tm
    return tm, tk, n_p


# ----------------------------- kernels ---------------------------------------

def proj_kernel(h_ref, w_ref, b_ref, xio_ref):
    """xio = h @ [W_in | W_out] + b  (bf16 MXU operands, f32 accumulate)."""
    xh = h_ref[...].astype(jnp.bfloat16)
    proj = jnp.dot(xh, w_ref[...], preferred_element_type=jnp.float32) + b_ref[...]
    xio_ref[...] = proj.astype(xio_ref.dtype)


def aggr_gru_kernel(a_in_ref, a_out_ref, xio_ref, h_ref, dinv_in_ref,
                    dinv_out_ref, w_hh_ref, b_hh_ref, w_ih_ref, b_ih_ref,
                    out_ref, acc_ref):
    """Tiled count-sum aggregation + mean rescale + lin_ih + lin_hh + GRU."""
    dp = h_ref.shape[-1]
    k = pl.program_id(1)

    @pl.when(k == 0)
    def _():
        acc_ref[...] = jnp.zeros_like(acc_ref)

    # int8 edge counts -> bf16 (VPU filler hidden under the A-tile DMA),
    # bf16 x bf16 MXU matmuls, f32 accumulation in VMEM scratch.
    a_in = a_in_ref[...].astype(jnp.bfloat16)
    a_out = a_out_ref[...].astype(jnp.bfloat16)
    acc_ref[:, :dp] += jnp.dot(a_in, xio_ref[:, :dp],
                               preferred_element_type=jnp.float32)
    acc_ref[:, dp:] += jnp.dot(a_out, xio_ref[:, dp:],
                               preferred_element_type=jnp.float32)

    @pl.when(k == pl.num_programs(1) - 1)
    def _():
        h = h_ref[...]
        # Exact mean: f32 count-sums * f32 (1/deg), then bf16 for the MXU.
        inp_in = (acc_ref[:, :dp] * dinv_in_ref[...]).astype(jnp.bfloat16)
        inp_out = (acc_ref[:, dp:] * dinv_out_ref[...]).astype(jnp.bfloat16)
        # gi = lin_ih([input_in | input_out]) split into two half-dots
        # (avoids materializing the concatenated bf16 slab).
        gi = (jnp.dot(inp_in, w_ih_ref[:dp, :],
                      preferred_element_type=jnp.float32)
              + jnp.dot(inp_out, w_ih_ref[dp:, :],
                        preferred_element_type=jnp.float32)
              + b_ih_ref[...])
        # gh = lin_hh(hidden), computed here from the resident h row tile.
        gh = jnp.dot(h.astype(jnp.bfloat16), w_hh_ref[...],
                     preferred_element_type=jnp.float32) + b_hh_ref[...]
        # dp is a multiple of 128 -> all gate slices are lane-aligned.
        i_r, i_i, i_n = gi[:, :dp], gi[:, dp:2 * dp], gi[:, 2 * dp:]
        h_r, h_i, h_n = gh[:, :dp], gh[:, dp:2 * dp], gh[:, 2 * dp:]
        reset_gate = jax.nn.sigmoid(i_r + h_r)
        input_gate = jax.nn.sigmoid(i_i + h_i)
        new_gate = jnp.tanh(i_n + reset_gate * h_n)
        out_ref[...] = h + input_gate * (new_gate - h)


# ----------------------------- host glue -------------------------------------

def build_adj_counts(src, dst, num_nodes):
    """int8 edge-count matrix counts[i,j] = #edges j->i, plus f32 1/in_degree."""
    # Built directly in int8: no transient f32 N x N array.
    # Note: assumes multiplicity of any (j->i) edge fits in int8 (<=127).
    ones = jnp.ones(src.shape, jnp.int8)
    counts = jnp.zeros((num_nodes, num_nodes), jnp.int8).at[dst, src].add(ones)
    deg = jnp.zeros((num_nodes,), jnp.float32).at[dst].add(1.0)
    dinv = jnp.where(deg > 0.0, 1.0 / jnp.maximum(deg, 1.0), 0.0)
    return counts, dinv.reshape(num_nodes, 1)


def srgnn_cell(hidden, edge_index, kparams):
    n, dim = hidden.shape
    dp = kparams['w_io'].shape[0]                  # padded feature dim (mult of 128)
    tm, tk, n_p = _tiles(n)

    h_p = jnp.zeros((n_p, dp), jnp.float32).at[:n, :dim].set(hidden)
    src, dst = edge_index[0], edge_index[1]
    a_in, dinv_in = build_adj_counts(src, dst, n_p)      # propagate(edge_index)
    a_out, dinv_out = build_adj_counts(dst, src, n_p)    # flipped edges

    # ---- kernel 1: fused input projections xio = h @ [W_in | W_out] + b ----
    xio = pl.pallas_call(
        proj_kernel,
        out_shape=jax.ShapeDtypeStruct((n_p, 2 * dp), jnp.bfloat16),
        grid_spec=pltpu.PrefetchScalarGridSpec(
            num_scalar_prefetch=0, grid=(n_p // tm,),
            in_specs=[pl.BlockSpec((tm, dp), lambda i: (i, 0)),
                      pl.BlockSpec((dp, 2 * dp), lambda i: (0, 0)),
                      pl.BlockSpec((1, 2 * dp), lambda i: (0, 0))],
            out_specs=pl.BlockSpec((tm, 2 * dp), lambda i: (i, 0))),
        compiler_params=pltpu.CompilerParams(
            dimension_semantics=("parallel",)),
    )(h_p, kparams['w_io'], kparams['b_io'])

    # ---- kernel 2: tiled aggregation + lin_ih + lin_hh + GRU ----------------
    flops = (4 * n_p * n_p * dp                       # two count matmuls
             + 2 * n_p * (2 * dp) * (3 * dp)          # lin_ih
             + 2 * n_p * dp * (3 * dp))               # lin_hh
    bytes_accessed = (2 * n_p * n_p                          # int8 adjacencies
                      + (n_p // tm) * n_p * 2 * dp * 2       # xio re-reads (bf16)
                      + 2 * n_p * dp * 4                     # h, out (f32)
                      + (2 * dp + dp) * (3 * dp) * 2)        # bf16 weights
    out_p = pl.pallas_call(
        aggr_gru_kernel,
        out_shape=jax.ShapeDtypeStruct((n_p, dp), jnp.float32),
        grid_spec=pltpu.PrefetchScalarGridSpec(
            num_scalar_prefetch=0, grid=(n_p // tm, n_p // tk),
            in_specs=[pl.BlockSpec((tm, tk), lambda i, k: (i, k)),        # A_in counts
                      pl.BlockSpec((tm, tk), lambda i, k: (i, k)),        # A_out counts
                      pl.BlockSpec((tk, 2 * dp), lambda i, k: (k, 0)),    # [x_in|x_out]
                      pl.BlockSpec((tm, dp), lambda i, k: (i, 0)),        # h rows (f32)
                      pl.BlockSpec((tm, 1), lambda i, k: (i, 0)),         # 1/deg_in
                      pl.BlockSpec((tm, 1), lambda i, k: (i, 0)),         # 1/deg_out
                      pl.BlockSpec((dp, 3 * dp), lambda i, k: (0, 0)),    # W_hh (bf16)
                      pl.BlockSpec((1, 3 * dp), lambda i, k: (0, 0)),     # b_hh
                      pl.BlockSpec((2 * dp, 3 * dp), lambda i, k: (0, 0)),  # W_ih (bf16)
                      pl.BlockSpec((1, 3 * dp), lambda i, k: (0, 0))],    # b_ih
            out_specs=pl.BlockSpec((tm, dp), lambda i, k: (i, 0)),
            scratch_shapes=[pltpu.VMEM((tm, 2 * dp), jnp.float32)]),
        compiler_params=pltpu.CompilerParams(
            dimension_semantics=("parallel", "arbitrary"),
            vmem_limit_bytes=24 * 1024 * 1024),
        cost_estimate=pl.CostEstimate(flops=int(flops),
                                      transcendentals=int(3 * n_p * dp),
                                      bytes_accessed=int(bytes_accessed)),
    )(a_in, a_out, xio, h_p, dinv_in, dinv_out,
      kparams['w_hh'], kparams['b_hh'], kparams['w_ih'], kparams['b_ih'])

    return out_p[:n, :dim]


# ----------------------------- params ----------------------------------------

def _pad_blocks(w, rb, cb, d, dp):
    # w: [rb*d, cb*d] -> [rb*dp, cb*dp]; each d x d block lands at the top-left
    # of its dp x dp slot so all downstream slices are lane/gate aligned.
    out = np.zeros((rb * dp, cb * dp), np.float32)
    w = np.asarray(w)
    for r in range(rb):
        for c in range(cb):
            out[r * dp:r * dp + d, c * dp:c * dp + d] = \
                w[r * d:(r + 1) * d, c * d:(c + 1) * d]
    return out


def _pad_bias(b, cb, d, dp):
    out = np.zeros((1, cb * dp), np.float32)
    b = np.asarray(b)
    for c in range(cb):
        out[0, c * dp:c * dp + d] = b[c * d:(c + 1) * d]
    return out


def init_params(key, dim, dp):
    # Mirrors SRGNNCell._reset_parameters: uniform(-1/sqrt(dim), 1/sqrt(dim)),
    # torch Linear weight layout (out_features, in_features).
    stdv = 1.0 / np.sqrt(dim)
    ks = jax.random.split(key, 8)
    u = lambda k, shape: jax.random.uniform(k, shape, jnp.float32, -stdv, stdv)
    w_in = u(ks[0], (dim, dim));         b_in = u(ks[1], (dim,))
    w_out = u(ks[2], (dim, dim));        b_out = u(ks[3], (dim,))
    w_ih = u(ks[4], (3 * dim, 2 * dim)); b_ih = u(ks[5], (3 * dim,))
    w_hh = u(ks[6], (3 * dim, dim));     b_hh = u(ks[7], (3 * dim,))

    raw = dict(w_in=w_in, b_in=b_in, w_out=w_out, b_out=b_out,
               w_ih=w_ih, b_ih=b_ih, w_hh=w_hh, b_hh=b_hh)

    # Fused, padded input-projection slab: [DP, 2*DP]  ->  [x_in | x_out]
    w_io = np.concatenate([
        _pad_blocks(np.asarray(w_in).T, 1, 1, dim, dp),
        _pad_blocks(np.asarray(w_out).T, 1, 1, dim, dp)], axis=1)
    b_io = np.concatenate([_pad_bias(b_in, 1, dim, dp),
                           _pad_bias(b_out, 1, dim, dp)], axis=1)
    # lin_hh: [3*dim, dim] -> padded transposed [DP, 3*DP]
    w_hh_p = _pad_blocks(np.asarray(w_hh).T, 1, 3, dim, dp)
    b_hh_p = _pad_bias(b_hh, 3, dim, dp)
    # lin_ih: [3*dim, 2*dim] -> padded transposed [2*DP, 3*DP]
    w_ih_p = _pad_blocks(np.asarray(w_ih).T, 2, 3, dim, dp)
    b_ih_p = _pad_bias(b_ih, 3, dim, dp)

    kparams = dict(
        w_io=jnp.asarray(w_io, jnp.bfloat16), b_io=jnp.asarray(b_io, jnp.float32),
        w_hh=jnp.asarray(w_hh_p, jnp.bfloat16), b_hh=jnp.asarray(b_hh_p, jnp.float32),
        w_ih=jnp.asarray(w_ih_p, jnp.bfloat16), b_ih=jnp.asarray(b_ih_p, jnp.float32))
    return kparams, raw


# ----------------------------- reference --------------------------------------

def build_mean_adj(src, dst, num_nodes):
    a = jnp.zeros((num_nodes, num_nodes), jnp.float32).at[dst, src].add(1.0)
    deg = a.sum(axis=1, keepdims=True)
    return a / jnp.where(deg == 0.0, 1.0, deg)


def srgnn_cell_ref(hidden, edge_index, raw):
    # Pure-JAX f32 reference reproducing the PyTorch forward exactly.
    n, _ = hidden.shape
    src, dst = edge_index[0], edge_index[1]
    a_in = build_mean_adj(src, dst, n)
    a_out = build_mean_adj(dst, src, n)
    input_in = a_in @ (hidden @ raw['w_in'].T + raw['b_in'])
    input_out = a_out @ (hidden @ raw['w_out'].T + raw['b_out'])
    inputs = jnp.concatenate([input_in, input_out], axis=-1)
    gi = inputs @ raw['w_ih'].T + raw['b_ih']
    gh = hidden @ raw['w_hh'].T + raw['b_hh']
    i_r, i_i, i_n = jnp.split(gi, 3, axis=-1)
    h_r, h_i, h_n = jnp.split(gh, 3, axis=-1)
    reset_gate = jax.nn.sigmoid(i_r + h_r)
    input_gate = jax.nn.sigmoid(i_i + h_i)
    new_gate = jnp.tanh(i_n + reset_gate * h_n)
    return (1.0 - input_gate) * hidden + input_gate * new_gate


if __name__ == "__main__":
    key = jax.random.PRNGKey(0)
    dim, n_nodes, n_edges = 32, 8, 16
    dp = _round_up(dim, 128)
    k_h, k_e1, k_e2, k_p = jax.random.split(key, 4)

    hidden = jax.random.normal(k_h, (n_nodes, dim), jnp.float32)
    src = jax.random.randint(k_e1, (n_edges,), 0, n_nodes, dtype=jnp.int32)
    dst = jax.random.randint(k_e2, (n_edges,), 0, n_nodes, dtype=jnp.int32)
    edge_index = jnp.stack([src, dst], axis=0)   # shape (2, E), like PyG

    kparams, raw = init_params(k_p, dim, dp)

    out = jax.block_until_ready(srgnn_cell(hidden, edge_index, kparams))
    ref = srgnn_cell_ref(hidden, edge_index, raw)
    # bf16 projected activations / bf16 weights bound the error vs the f32 ref
    # (adjacency counts + 1/deg rescale are exact).
    assert np.allclose(np.asarray(out), np.asarray(ref), atol=2e-2, rtol=2e-2), \
        "Pallas SRGNNCell output mismatch vs reference"
    print("KERNEL_OK")
</pallas_src>

<mosaic_0001>
module attributes {stable_mosaic.version = 11 : i64} {
  func.func @proj_kernel(%arg0: i32, %arg1: memref<128x128xf32, #tpu.memory_space<vmem>>, %arg2: memref<128x256xbf16, #tpu.memory_space<vmem>>, %arg3: memref<1x256xf32, #tpu.memory_space<vmem>>, %arg4: memref<128x256xbf16, #tpu.memory_space<vmem>>) attributes {dimension_semantics = [#tpu.dimension_semantics<parallel>], iteration_bounds = array<i64: 2>, scalar_prefetch = 0 : i64, scratch_operands = 0 : i64, tpu.core_type = #tpu.core_type<tc>, window_params = [{transform_indices = @transform_0, window_bounds = array<i64: 128, 128>}, {pipeline_mode = #tpu.pipeline_mode<synchronous>, transform_indices = @transform_1, window_bounds = array<i64: 128, 256>}, {pipeline_mode = #tpu.pipeline_mode<synchronous>, transform_indices = @transform_2, window_bounds = array<i64: 1, 256>}, {transform_indices = @transform_3, window_bounds = array<i64: 128, 256>}]} {
    %c0 = arith.constant 0 : index
    %c0_0 = arith.constant 0 : index
    %0 = vector.load %arg1[%c0, %c0_0] : memref<128x128xf32, #tpu.memory_space<vmem>>, vector<128x128xf32>
    %1 = arith.truncf %0 : vector<128x128xf32> to vector<128x128xbf16>
    %c0_1 = arith.constant 0 : index
    %c0_2 = arith.constant 0 : index
    %2 = vector.load %arg2[%c0_1, %c0_2] : memref<128x256xbf16, #tpu.memory_space<vmem>>, vector<128x256xbf16>
    %cst = arith.constant dense<0.000000e+00> : vector<128x256xf32>
    %3 = tpu.matmul %1, %2, %cst {dimension_numbers = #tpu.dot_dimension_numbers<[1], [0], [0], [1], [0, 0, 1, 1], [], []>} : vector<128x128xbf16>, vector<128x256xbf16>, vector<128x256xf32> -> vector<128x256xf32>
    %c0_3 = arith.constant 0 : index
    %c0_4 = arith.constant 0 : index
    %4 = vector.load %arg3[%c0_3, %c0_4] : memref<1x256xf32, #tpu.memory_space<vmem>>, vector<1x256xf32>
    %5 = vector.broadcast %4 : vector<1x256xf32> to vector<128x256xf32>
    %6 = arith.addf %3, %5 : vector<128x256xf32>
    %7 = arith.truncf %6 : vector<128x256xf32> to vector<128x256xbf16>
    %c0_5 = arith.constant 0 : index
    %c0_6 = arith.constant 0 : index
    %8 = vector.load %arg4[%c0_5, %c0_6] : memref<128x256xbf16, #tpu.memory_space<vmem>>, vector<128x256xbf16>
    tpu.vector_store %arg4[%c0_5, %c0_6], %7 {strides = array<i32>} : memref<128x256xbf16, #tpu.memory_space<vmem>>, vector<128x256xbf16>,
    return
  }
  func.func @transform_0(%arg0: i32) -> (i32, i32) {
    %c0_i32 = arith.constant 0 : i32
    %c0_i32_0 = arith.constant 0 : i32
    return %arg0, %c0_i32 : i32, i32
  }
  func.func @transform_1(%arg0: i32) -> (i32, i32) {
    %c0_i32 = arith.constant 0 : i32
    %c0_i32_0 = arith.constant 0 : i32
    %c0_i32_1 = arith.constant 0 : i32
    return %c0_i32, %c0_i32_0 : i32, i32
  }
  func.func @transform_2(%arg0: i32) -> (i32, i32) {
    %c0_i32 = arith.constant 0 : i32
    %c0_i32_0 = arith.constant 0 : i32
    %c0_i32_1 = arith.constant 0 : i32
    return %c0_i32, %c0_i32_0 : i32, i32
  }
  func.func @transform_3(%arg0: i32) -> (i32, i32) {
    %c0_i32 = arith.constant 0 : i32
    %c0_i32_0 = arith.constant 0 : i32
    return %arg0, %c0_i32 : i32, i32
  }
}

</mosaic_0001>

<bundles_post_ra>
// kernel: tpu_custom_call.1
= control target key start
LH: loop header
LB: loop body
LE: loop exit
PB: predicated region body
PF: predicated region fallthrough
CT: control target
= control target key end

     0   :  { %8 = vsyncpa [#allocation3], 0  ;;  %s1285_s0 = inlined_call_operand.hbm [shape: f32[256,128], index: 0, kind: input, shape index: {}]   ;;  %s1286_s1 = inlined_call_operand.hbm [shape: bf16[128,256], index: 1, kind: input, shape index: {}]   ;;  %s1287_s2 = inlined_call_operand.vmem [shape: f32[1,256], index: 2, kind: input, shape index: {}]   ;;  %s1288_s3 = inlined_call_operand.hbm [shape: bf16[256,256], index: 3, kind: output, shape index: {}]  }
   0x1   :  { %10 = vsyncpa [#allocation3 + $0x1], 0 }
   0x2   :  { %11 = vsyncpa [#allocation6], 0 }
   0x3   :  { %12 = vsyncpa [#allocation4], 0 }
   0x4   :  { %14 = vsyncpa [#allocation4 + $0x1], 0  ;;  %s990_s12 = smov 0   ;;  %s992_s13 = smov 0  }
   0x5   :  { %s994_s14 = smov 0   ;;  %s996_s15 = smov 0  }
   0x6 LB: > { %s1011_s16 = sadd.s32 4294967295, %s960_s15   ;;  %s662_s17 = sadd.s32 4294967294, %s960_s15   ;;  %s960_s15 = sphi %s996_s15, %s1308_s15   ;;  %s956_s14 = sphi %s994_s14, %s1307_s14   ;;  %s952_s13 = sphi %s992_s13, %s1306_s13   ;;  %s948_s12 = sphi %s990_s12, %s1305_s12  }
   0x7   : > { %p40_p0 = scmp.ne.s32.totalorder %s952_s13, %s948_s12  ;;  %p1289_p1 = scmp.eq.s32.totalorder %s1011_s16, 0 }
   0x8   : > { %p112_p3 = scmp.eq.s32.totalorder %s662_s17, 1  ;;  %p663_p5 = scmp.ge.s32.totalorder %s960_s15, 1 }
   0x9   : > { %p1020_p4 = por %p1289_p1, %p40_p0  ;;  %p119_p7 = scmp.lt.s32.totalorder %s960_s15, 3 }
   0xa   : > { %p1025_p6 = por %p112_p3, %p40_p0  ;;  %s962_s21 = smov [#allocation5]  }
   0xb   : > { %s1292_s18 = scalar_select %p1020_p4, 1, 0 }
   0xc   : > { %s1293_s19 = scalar_select %p1025_p6, 1, 0 }
   0xd   : > { %p1030_p8 = pnand %p663_p5, %p119_p7  ;;  %s131_s22 = sshll.u32 %s962_s21, 4  ;;  %s1034_s22 = int_to_ptr.vmem [resolvable:$true] %s131_s22 }
   0xe   : > { %s1046_s24 = sadd.s32 1, %s960_s15   ;;  %s27_s25 = sadd.s32 1, %s956_s14 }
   0xf   : > { %s1294_s20 = scalar_select %p1030_p8, 1, 0 }
  0x10   : > { %p754_p9 = pneg %p1030_p8  ;;  %s24_s26 = ssub.s32 %s960_s15, %s1046_s24 }
  0x11   : > { %s832_s29 = scalar_lea.hbm %s1286_s1, 2048 }
  0x12   : > { %p1041_p11 = pnand %p754_p9, %p1289_p1  ;;  %p833_p12 = scmp.ne.s32.totalorder %s1286_s1, %s832_s29 }
  0x13   : > { %p839_p5 = scmp.lt.u32.totalorder %s832_s29, %s1286_s1 }
  0x14   : > { %p834_p13 = pneg %p1041_p11 }
  0x16   : > { %p835_p0 = pnand %p834_p13, %p833_p12 }
  0x18   : > { %p836_p3 = pneg %p835_p0 }
  0x1a   : > { %p841_p7 = pnand %p839_p5, %p836_p3 }
  0x1c   : > { %844 = shalt.err (!%p841_p7)
}
  0x1d   : > { %s845_s7 = scalar_lea.vmem %s1034_s22, 2048  ;;  %p853_p2 = scmp.lt.s32.totalorder %s1034_s22, %s1034_s22 }
  0x1e   : > { %p846_p9 = scmp.ne.s32.totalorder %s1034_s22, %s845_s7  ;;  %p854_p6 = scmp.lt.s32.totalorder %s845_s7, %s845_s7 }
  0x20   : > { %p848_p10 = pnand %p846_p9, %p834_p13  ;;  %p855_p4 = por %p854_p6, %p853_p2 }
  0x22   : > { %p849_p1 = pneg %p848_p10 }
  0x24   : > { %p856_p8 = pnand %p855_p4, %p849_p1 }
  0x26   : > { %859 = shalt.err (!%p856_p8)
}
  0x27   : > { %s963_s8 = smov 128   ;;  %s964_s9 = smov 8  }
  0x28   : > { %757 = dma.hbm_to_vmem [thread:$0]  (!%p1041_p11), %s1286_s1, 2048, %s1034_s22, [#allocation6], %s963_s8, %s963_s8, %s964_s9  }
  0x29   : > { %p25_p1 = scmp.eq.s32.totalorder %s24_s26, 0  ;;  %p34_p2 = scmp.ne.s32.totalorder %s956_s14, %s952_s13 }
  0x2a   : > { %p35_p4 = scmp.eq.s32.totalorder %s960_s15, 0  ;;  %p767_p6 = scmp.lt.s32.totalorder %s960_s15, 2 }
  0x2b   : > { %s1080_s17 = scalar_select %p25_p1, %s956_s14, %s27_s25  }
  0x2c   : > { %p36_p8 = por %p35_p4, %p34_p2  ;;  %p1296_p10 = scmp.eq.s32.totalorder %s1011_s16, 1 }
  0x2d   : > { %s148_s23 = sand.u32 1, %s956_s14   ;;  %s711_s27 = sshll.u32 %s960_s15, 11 }
  0x2e   : > { %p1084_p12 = por %p1296_p10, %p34_p2  ;;  %s666_s28 = sshll.u32 %s148_s23, 7 }
  0x2f   : > { %s1093_s4 = scalar_lea.hbm %s1285_s0, %s711_s27  ;;  %s152_s22 = scalar_lea.vmem [#allocation2], %s666_s28 }
  0x30   : > { %s159_s25 = sshll.u32 %s152_s22, 4  ;;  %p1095_p11 = pnand %p767_p6, %p36_p8  ;;  %s1099_s25 = int_to_ptr.vmem [resolvable:$true] %s159_s25 }
  0x31   : > { %s1101_s5 = scalar_lea.sflag [#allocation3], %s148_s23  ;;  %s860_s6 = scalar_lea.hbm %s1093_s4, 2048 }
  0x32   : > { %p861_p13 = scmp.ne.s32.totalorder %s1093_s4, %s860_s6  ;;  %p862_p0 = pneg %p1095_p11 }
  0x33   : > { %s865_s11 = scalar_lea.hbm %s1285_s0, 4096  ;;  %p866_p7 = scmp.lt.u32.totalorder %s1093_s4, %s1285_s0 }
  0x34   : > { %p863_p3 = pnand %p862_p0, %p861_p13  ;;  %p867_p9 = scmp.lt.u32.totalorder %s865_s11, %s860_s6 }
  0x35   : > { %p869_p2 = scmp.lt.u32.totalorder %s860_s6, %s1093_s4 }
  0x36   : > { %p864_p5 = pneg %p863_p3  ;;  %p868_p1 = por %p867_p9, %p866_p7 }
  0x38   : > { %p870_p4 = por %p869_p2, %p868_p1 }
  0x3a   : > { %p871_p6 = pnand %p870_p4, %p864_p5 }
  0x3c   : > { %874 = shalt.err (!%p871_p6)
}
  0x3d   : > { %s875_s23 = scalar_lea.vmem %s1099_s25, 2048  ;;  %s965_s29 = smov [#allocation2]  }
  0x3e   : > { %p876_p8 = scmp.ne.s32.totalorder %s1099_s25, %s875_s23  ;;  %s880_s30 = sshll.u32 %s965_s29, 4  ;;  %s881_s30 = int_to_ptr.vmem [resolvable:$false] %s880_s30 }
  0x3f   : > { %s882_s22 = scalar_lea.vmem %s881_s30, 4096  ;;  %p883_p3 = scmp.lt.s32.totalorder %s1099_s25, %s881_s30 }
  0x40   : > { %p878_p10 = pnand %p876_p8, %p862_p0  ;;  %p884_p7 = scmp.lt.s32.totalorder %s882_s22, %s875_s23 }
  0x42   : > { %p879_p13 = pneg %p878_p10  ;;  %p885_p9 = por %p884_p7, %p883_p3 }
  0x44   : > { %p886_p1 = pnand %p885_p9, %p879_p13 }
  0x46   : > { %889 = shalt.err (!%p886_p1)
}
  0x47   : > { %761 = dma.hbm_to_vmem [thread:$0]  (!%p1095_p11), %s1093_s4, 2048, %s1099_s25, %s1101_s5, %s963_s8, %s963_s8, %s964_s9  }
  0x48   : > { %p1299_p0 = scmp.ne.s32.totalorder %s1294_s20, 0 }
  0x49   : > { %s1135_s6 = sand.u32 (!%p1299_p0), 1, %s952_s13   ;;  %p1300_p5 = scmp.ne.s32.totalorder (!%p1299_p0), %s1292_s18, 0 }
  0x4a   : > { %171 = sbr.rel (%p1299_p0) target bundleno = 377 (0x179), region = 32  ;;  %s670_s7 = sshll.u32 (!%p1299_p0), %s1135_s6, 7 }
  0x4b   : > { %s174_s10 = scalar_lea.sflag (!%p1299_p0), [#allocation3], %s1135_s6  ;;  %s1141_s26 = scalar_lea.vmem (!%p1299_p0), [#allocation2], %s670_s7 }
  0x51   : > { %935 = dma.done.wait (%p1300_p5), %s174_s10, 2048  }
  0x52   : > { %937 = vsyncadd (%p1300_p5), %s174_s10, 4294965248  ;;  %p1301_p11 = scmp.eq.s32.totalorder %s1011_s16, 0 }
  0x54   : > { %939 = dma.done.wait (%p1301_p11), [#allocation6], 2048   ;;  %p1302_p2 = pmov %p1301_p11 }
  0x55   : > { %v966_v0 = vmov 0   ;;  %v808_v1 = vld [vmem:[#allocation5 + $0x4] ss:$8 sps:$4 sm:$0xff]   ;;  %v810_v2 = vld [vmem:[#allocation5] ss:$8 sps:$4 sm:$0xff]   ;;  %v209_v23 = vld [vmem:[%s1141_s26 + $0x10] sm:$0xff]  ;;  %v249_v41 = vlaneseq }
  0x56   : > { %941 = vsyncadd (%p1302_p2), [#allocation6], 4294965248  ;;  %371 = vmatprep.mubr.bf16.mxu0 %v966_v0  ;;  %411 = vmatprep.mubr.bf16.mxu1 %v966_v0  ;;  %v811_v3 = vld [vmem:[#allocation5 + $0x14] ss:$8 sps:$4 sm:$0xff]   ;;  %v813_v4 = vld [vmem:[#allocation5 + $0x10] ss:$8 sps:$4 sm:$0xff]  }
  0x57   : > { %339 = vmatprep.subr.bf16.mxu0 %v808_v1  ;;  %730 = vmatprep.subr.bf16.mxu1 %v808_v1  ;;  %v814_v5 = vld [vmem:[#allocation5 + $0x24] ss:$8 sps:$4 sm:$0xff]   ;;  %v816_v6 = vld [vmem:[#allocation5 + $0x20] ss:$8 sps:$4 sm:$0xff]   ;;  %v817_v7 = vld [vmem:[#allocation5 + $0x34] ss:$8 sps:$4 sm:$0xff]  }
  0x58   : > { %340 = vmatpush1.bf16.msra.mxu0 %v810_v2  ;;  %738 = vmatpush1.bf16.msra.mxu1 %v810_v2  ;;  %v819_v8 = vld [vmem:[#allocation5 + $0x30] ss:$8 sps:$4 sm:$0xff]   ;;  %v820_v9 = vld [vmem:[#allocation5 + $0x44] ss:$8 sps:$4 sm:$0xff]   ;;  %v822_v10 = vld [vmem:[#allocation5 + $0x40] ss:$8 sps:$4 sm:$0xff]  }
  0x59   : > { %341 = vmatprep.subr.bf16.mxu0 %v811_v3  ;;  %731 = vmatprep.subr.bf16.mxu1 %v811_v3  ;;  %v823_v11 = vld [vmem:[#allocation5 + $0x54] ss:$8 sps:$4 sm:$0xff]   ;;  %v825_v12 = vld [vmem:[#allocation5 + $0x50] ss:$8 sps:$4 sm:$0xff]   ;;  %v826_v13 = vld [vmem:[#allocation5 + $0x64] ss:$8 sps:$4 sm:$0xff]  }
  0x5a   : > { %v828_v14 = vld [vmem:[#allocation5 + $0x60] ss:$8 sps:$4 sm:$0xff]   ;;  %v829_v15 = vld [vmem:[#allocation5 + $0x74] ss:$8 sps:$4 sm:$0xff]   ;;  %v831_v16 = vld [vmem:[#allocation5 + $0x70] ss:$8 sps:$4 sm:$0xff]  }
  0x5b   : > { %v207_v17 = vld [vmem:[%s1141_s26] sm:$0xff]  ;;  %v208_v18 = vld [vmem:[%s1141_s26 + $0x8] sm:$0xff]  ;;  %v210_v24 = vld [vmem:[%s1141_s26 + $0x18] sm:$0xff]  ;;  %v250_v42 = vshrl.u32 %v249_v41, 7  ;;  %s1192_s8 = scalar_lea.vmem [#allocation7], %s670_s7  ;;  %s729_s9 = sshll.u32 %s1011_s16, 11 }
  0x5c   : > { %342 = vmatpush1.bf16.msra.mxu0 %v813_v4  ;;  %739 = vmatpush1.bf16.msra.mxu1 %v813_v4  ;;  %v215_v19 = vld [vmem:[%s1141_s26 + $0x40] sm:$0xff]  ;;  %v216_v20 = vld [vmem:[%s1141_s26 + $0x48] sm:$0xff]  ;;  %v223_v21 = vpack.c.bf16 %v208_v18, %v207_v17  ;;  %v217_v25 = vld [vmem:[%s1141_s26 + $0x50] sm:$0xff]  ;;  %v224_v27 = vpack.c.bf16 %v210_v24, %v209_v23  ;;  %s579_s4 = sshll.u32 %s1192_s8, 4  ;;  %s1235_s16 = scalar_lea.hbm %s1288_s3, %s729_s9  ;;  %s1237_s4 = int_to_ptr.vmem [resolvable:$true] %s579_s4 }
  0x5d   : > { %343 = vmatprep.subr.bf16.mxu0 %v814_v5  ;;  %732 = vmatprep.subr.bf16.mxu1 %v814_v5  ;;  %v227_v22 = vpack.c.bf16 %v216_v20, %v215_v19  ;;  %v218_v26 = vld [vmem:[%s1141_s26 + $0x58] sm:$0xff]  ;;  %v211_v29 = vld [vmem:[%s1141_s26 + $0x20] sm:$0xff]  ;;  %v212_v30 = vld [vmem:[%s1141_s26 + $0x28] sm:$0xff]  ;;  %v251_v43 = vsub.s32 0, %v250_v42  ;;  %v255_v45 = vsub.s32 1, %v250_v42  ;;  %s565_s11 = scalar_lea.sflag [#allocation4], %s1135_s6 }
  0x5e   : > { %v228_v28 = vpack.c.bf16 %v218_v26, %v217_v25  ;;  %v219_v31 = vld [vmem:[%s1141_s26 + $0x60] sm:$0xff]  ;;  %v220_v32 = vld [vmem:[%s1141_s26 + $0x68] sm:$0xff]  ;;  %v225_v33 = vpack.c.bf16 %v212_v30, %v211_v29  ;;  %v213_v35 = vld [vmem:[%s1141_s26 + $0x30] sm:$0xff]  ;;  %s890_s27 = scalar_lea.vmem %s1237_s4, 2048  ;;  %s967_s28 = smov [#allocation7]  }
  0x5f   : > { %v229_v34 = vpack.c.bf16 %v220_v32, %v219_v31  ;;  %v214_v36 = vld [vmem:[%s1141_s26 + $0x38] sm:$0xff]  ;;  %v221_v37 = vld [vmem:[%s1141_s26 + $0x70] sm:$0xff]  ;;  %v247_v44 = vld [vmem:[%s1287_s2] sm:$0x3]  ;;  %p891_p4 = scmp.ne.s32.totalorder %s1237_s4, %s890_s27  ;;  %s894_s23 = sshll.u32 %s967_s28, 4  ;;  %s895_s23 = int_to_ptr.vmem [resolvable:$false] %s894_s23 }
  0x60   : > { %344 = vmatpush1.bf16.msra.mxu0 %v816_v6  ;;  %740 = vmatpush1.bf16.msra.mxu1 %v816_v6  ;;  %v222_v38 = vld [vmem:[%s1141_s26 + $0x78] sm:$0xff]  ;;  %v226_v39 = vpack.c.bf16 %v214_v36, %v213_v35  ;;  %v1178_v46 = vrot.slane %v247_v44, %v251_v43  ;;  %v1180_v47 = vrot.slane %v247_v44, %v255_v45  ;;  %s896_s29 = scalar_lea.vmem %s895_s23, 4096  ;;  %p897_p10 = scmp.lt.s32.totalorder %s1237_s4, %s895_s23 }
  0x61   : > { %345 = vmatprep.subr.bf16.mxu0 %v817_v7  ;;  %733 = vmatprep.subr.bf16.mxu1 %v817_v7  ;;  %v230_v40 = vpack.c.bf16 %v222_v38, %v221_v37  ;;  %p892_p6 = pnand %p891_p4, %p1084_p12  ;;  %p898_p13 = scmp.lt.s32.totalorder %s896_s29, %s890_s27 }
  0x63   : > { %p893_p8 = pneg %p892_p6  ;;  %p899_p3 = por %p898_p13, %p897_p10 }
  0x64   : > { %346 = vmatpush1.bf16.msra.mxu0 %v819_v8  ;;  %741 = vmatpush1.bf16.msra.mxu1 %v819_v8 }
  0x65   : > { %347 = vmatprep.subr.bf16.mxu0 %v820_v9  ;;  %734 = vmatprep.subr.bf16.mxu1 %v820_v9  ;;  %p900_p7 = pnand %p899_p3, %p893_p8 }
  0x68   : > { %348 = vmatpush1.bf16.msra.mxu0 %v822_v10  ;;  %742 = vmatpush1.bf16.msra.mxu1 %v822_v10 }
  0x69   : > { %349 = vmatprep.subr.bf16.mxu0 %v823_v11  ;;  %735 = vmatprep.subr.bf16.mxu1 %v823_v11 }
  0x6c   : > { %350 = vmatpush1.bf16.msra.mxu0 %v825_v12  ;;  %743 = vmatpush1.bf16.msra.mxu1 %v825_v12 }
  0x6d   : > { %351 = vmatprep.subr.bf16.mxu0 %v826_v13  ;;  %736 = vmatprep.subr.bf16.mxu1 %v826_v13 }
  0x70   : > { %352 = vmatpush1.bf16.msra.mxu0 %v828_v14  ;;  %744 = vmatpush1.bf16.msra.mxu1 %v828_v14 }
  0x71   : > { %353 = vmatprep.subr.bf16.mxu0 %v829_v15  ;;  %737 = vmatprep.subr.bf16.mxu1 %v829_v15 }
  0x74   : > { %354 = vmatpush1.bf16.msra.mxu0 %v831_v16  ;;  %745 = vmatpush1.bf16.msra.mxu1 %v831_v16 }
  0x77   : > { %372 = vmatmul.mubr.bf16.vlgmr.msra.gmra.mrb[0].mxu0 %v223_v21  ;;  %412 = vmatmul.mubr.bf16.vlgmr.msra.gmra.mrb[0].mxu1 %v227_v22 }
  0x78   : > { %381 = vmatprep.mubr.bf16.mxu0 %v966_v0  ;;  %421 = vmatprep.mubr.bf16.mxu1 %v966_v0 }
  0x7f   : > { %382 = vmatmul.mubr.bf16.gmra.mrb[4].mxu0 %v224_v27  ;;  %422 = vmatmul.mubr.bf16.gmra.mrb[4].mxu1 %v228_v28 }
  0x80   : > { %391 = vmatprep.mubr.bf16.mxu0 %v966_v0  ;;  %431 = vmatprep.mubr.bf16.mxu1 %v966_v0 }
  0x87   : > { %392 = vmatmul.mubr.bf16.gmra.mrb[8].mxu0 %v225_v33  ;;  %432 = vmatmul.mubr.bf16.gmra.mrb[8].mxu1 %v229_v34 }
  0x88   : > { %401 = vmatprep.mubr.bf16.mxu0 %v966_v0  ;;  %441 = vmatprep.mubr.bf16.mxu1 %v966_v0 }
  0x8f   : > { %402 = vmatmul.mubr.bf16.gmra.mrb[12].mxu0 %v226_v39  ;;  %442 = vmatmul.mubr.bf16.gmra.mrb[12].mxu1 %v230_v40 }
 0x14a   : > { %v373_v48 = vpop.f32.mrb[0].mxu0  ;;  %v413_v49 = vpop.f32.mrb[0].mxu1 }
 0x14b   : > { %v374_v50 = vadd.f32 %v373_v48, %v1178_v46  ;;  %v414_v51 = vadd.f32 %v413_v49, %v1178_v46  ;;  %v375_v52 = vpop.f32.mrb[1].mxu0  ;;  %v415_v53 = vpop.f32.mrb[1].mxu1 }
 0x14c   : > { %v376_v54 = vadd.f32 %v375_v52, %v1180_v47  ;;  %v416_v55 = vadd.f32 %v415_v53, %v1180_v47  ;;  %v377_v56 = vpop.f32.mrb[2].mxu0  ;;  %v417_v57 = vpop.f32.mrb[2].mxu1 }
 0x14d   : > { %v378_v58 = vadd.f32 %v377_v56, %v1178_v46  ;;  %v418_v59 = vadd.f32 %v417_v57, %v1178_v46  ;;  %v379_v60 = vpop.f32.mrb[3].mxu0  ;;  %v419_v61 = vpop.f32.mrb[3].mxu1 }
 0x14e   : > { %v712_v62 = vpack.c.bf16 %v376_v54, %v374_v50  ;;  %v720_v63 = vpack.c.bf16 %v416_v55, %v414_v51  ;;  %v380_v0 = vadd.f32 %v379_v60, %v1180_v47  ;;  %v420_v1 = vadd.f32 %v419_v61, %v1180_v47 }
 0x150   : > { %548 = vst [vmem:[%s1192_s8] sm:$0xff] %v712_v62  ;;  %556 = vst [vmem:[%s1192_s8 + $0x40] sm:$0xff] %v720_v63  ;;  %v713_v2 = vpack.c.bf16 %v380_v0, %v378_v58  ;;  %v721_v3 = vpack.c.bf16 %v420_v1, %v418_v59 }
 0x152   : > { %549 = vst [vmem:[%s1192_s8 + $0x8] sm:$0xff] %v713_v2  ;;  %557 = vst [vmem:[%s1192_s8 + $0x48] sm:$0xff] %v721_v3  ;;  %v383_v4 = vpop.f32.mrb[4].mxu0  ;;  %v423_v5 = vpop.f32.mrb[4].mxu1 }
 0x153   : > { %v384_v6 = vadd.f32 %v383_v4, %v1178_v46  ;;  %v424_v7 = vadd.f32 %v423_v5, %v1178_v46  ;;  %v385_v8 = vpop.f32.mrb[5].mxu0  ;;  %v425_v9 = vpop.f32.mrb[5].mxu1 }
 0x154   : > { %v386_v10 = vadd.f32 %v385_v8, %v1180_v47  ;;  %v426_v11 = vadd.f32 %v425_v9, %v1180_v47  ;;  %v387_v12 = vpop.f32.mrb[6].mxu0  ;;  %v427_v13 = vpop.f32.mrb[6].mxu1 }
 0x155   : > { %v388_v14 = vadd.f32 %v387_v12, %v1178_v46  ;;  %v428_v15 = vadd.f32 %v427_v13, %v1178_v46  ;;  %v389_v16 = vpop.f32.mrb[7].mxu0  ;;  %v429_v17 = vpop.f32.mrb[7].mxu1 }
 0x156   : > { %v714_v18 = vpack.c.bf16 %v386_v10, %v384_v6  ;;  %v722_v19 = vpack.c.bf16 %v426_v11, %v424_v7  ;;  %v390_v20 = vadd.f32 %v389_v16, %v1180_v47  ;;  %v430_v21 = vadd.f32 %v429_v17, %v1180_v47 }
 0x158   : > { %550 = vst [vmem:[%s1192_s8 + $0x10] sm:$0xff] %v714_v18  ;;  %558 = vst [vmem:[%s1192_s8 + $0x50] sm:$0xff] %v722_v19  ;;  %v715_v22 = vpack.c.bf16 %v390_v20, %v388_v14  ;;  %v723_v23 = vpack.c.bf16 %v430_v21, %v428_v15 }
 0x15a   : > { %551 = vst [vmem:[%s1192_s8 + $0x18] sm:$0xff] %v715_v22  ;;  %559 = vst [vmem:[%s1192_s8 + $0x58] sm:$0xff] %v723_v23  ;;  %v393_v24 = vpop.f32.mrb[8].mxu0  ;;  %v433_v25 = vpop.f32.mrb[8].mxu1 }
 0x15b   : > { %v394_v26 = vadd.f32 %v393_v24, %v1178_v46  ;;  %v434_v27 = vadd.f32 %v433_v25, %v1178_v46  ;;  %v395_v28 = vpop.f32.mrb[9].mxu0  ;;  %v435_v29 = vpop.f32.mrb[9].mxu1 }
 0x15c   : > { %v396_v30 = vadd.f32 %v395_v28, %v1180_v47  ;;  %v436_v31 = vadd.f32 %v435_v29, %v1180_v47  ;;  %v397_v32 = vpop.f32.mrb[10].mxu0  ;;  %v437_v33 = vpop.f32.mrb[10].mxu1 }
 0x15d   : > { %v398_v34 = vadd.f32 %v397_v32, %v1178_v46  ;;  %v438_v35 = vadd.f32 %v437_v33, %v1178_v46  ;;  %v399_v36 = vpop.f32.mrb[11].mxu0  ;;  %v439_v37 = vpop.f32.mrb[11].mxu1 }
 0x15e   : > { %v716_v38 = vpack.c.bf16 %v396_v30, %v394_v26  ;;  %v724_v39 = vpack.c.bf16 %v436_v31, %v434_v27  ;;  %v400_v40 = vadd.f32 %v399_v36, %v1180_v47  ;;  %v440_v41 = vadd.f32 %v439_v37, %v1180_v47 }
 0x160   : > { %552 = vst [vmem:[%s1192_s8 + $0x20] sm:$0xff] %v716_v38  ;;  %560 = vst [vmem:[%s1192_s8 + $0x60] sm:$0xff] %v724_v39  ;;  %v717_v42 = vpack.c.bf16 %v400_v40, %v398_v34  ;;  %v725_v43 = vpack.c.bf16 %v440_v41, %v438_v35 }
 0x162   : > { %553 = vst [vmem:[%s1192_s8 + $0x28] sm:$0xff] %v717_v42  ;;  %561 = vst [vmem:[%s1192_s8 + $0x68] sm:$0xff] %v725_v43  ;;  %v403_v44 = vpop.f32.mrb[12].mxu0  ;;  %v443_v45 = vpop.f32.mrb[12].mxu1 }
 0x163   : > { %v404_v48 = vadd.f32 %v403_v44, %v1178_v46  ;;  %v444_v49 = vadd.f32 %v443_v45, %v1178_v46  ;;  %v405_v50 = vpop.f32.mrb[13].mxu0  ;;  %v445_v51 = vpop.f32.mrb[13].mxu1 }
 0x164   : > { %v406_v52 = vadd.f32 %v405_v50, %v1180_v47  ;;  %v446_v53 = vadd.f32 %v445_v51, %v1180_v47  ;;  %v407_v54 = vpop.f32.mrb[14].mxu0  ;;  %v447_v55 = vpop.f32.mrb[14].mxu1 }
 0x165   : > { %v408_v56 = vadd.f32 %v407_v54, %v1178_v46  ;;  %v448_v57 = vadd.f32 %v447_v55, %v1178_v46  ;;  %v409_v58 = vpop.f32.mrb[15].mxu0  ;;  %v449_v59 = vpop.f32.mrb[15].mxu1 }
 0x166   : > { %v718_v60 = vpack.c.bf16 %v406_v52, %v404_v48  ;;  %v726_v61 = vpack.c.bf16 %v446_v53, %v444_v49  ;;  %v410_v62 = vadd.f32 %v409_v58, %v1180_v47  ;;  %v450_v63 = vadd.f32 %v449_v59, %v1180_v47 }
 0x168   : > { %554 = vst [vmem:[%s1192_s8 + $0x30] sm:$0xff] %v718_v60  ;;  %562 = vst [vmem:[%s1192_s8 + $0x70] sm:$0xff] %v726_v61  ;;  %v719_v46 = vpack.c.bf16 %v410_v62, %v408_v56  ;;  %v727_v0 = vpack.c.bf16 %v450_v63, %v448_v57 }
 0x16a   : > { %555 = vst [vmem:[%s1192_s8 + $0x38] sm:$0xff] %v719_v46  ;;  %563 = vst [vmem:[%s1192_s8 + $0x78] sm:$0xff] %v727_v0 }
 0x16b   : > { %903 = shalt.err (!%p900_p7)
}
 0x16c   : > { %s904_s30 = scalar_lea.hbm %s1235_s16, 2048  ;;  %s908_s10 = scalar_lea.hbm %s1288_s3, 4096 }
 0x16d   : > { %p905_p9 = scmp.ne.s32.totalorder %s1235_s16, %s904_s30  ;;  %p909_p5 = scmp.lt.u32.totalorder %s1235_s16, %s1288_s3 }
 0x16e   : > { %p910_p11 = scmp.lt.u32.totalorder %s908_s10, %s904_s30  ;;  %p912_p4 = scmp.lt.u32.totalorder %s904_s30, %s1235_s16 }
 0x16f   : > { %p906_p1 = pnand %p905_p9, %p1084_p12 }
 0x170   : > { %p911_p2 = por %p910_p11, %p909_p5 }
 0x171   : > { %p907_p0 = pneg %p906_p1 }
 0x172   : > { %p913_p6 = por %p912_p4, %p911_p2 }
 0x174   : > { %p914_p8 = pnand %p913_p6, %p907_p0 }
 0x176   : > { %917 = shalt.err (!%p914_p8)
}
 0x177   : > { %s968_s20 = smov 128   ;;  %s969_s8 = smov 8  }
 0x178   : > { %752 = dma.vmem_to_hbm [thread:$0]  (%p1084_p12), %s1237_s4, 2048, %s1235_s16, %s565_s11, %s968_s20, %s968_s20, %s969_s8  }
 0x179 PF: > { %s594_s9 = sand.u32 1, %s948_s12   ;;  %p1303_p10 = scmp.ne.s32.totalorder %s1293_s19, 0 }
 0x17a   : > { %p1304_p13 = scmp.ge.s32.totalorder %s960_s15, 2  ;;  %s595_s25 = scalar_lea.sflag [#allocation4], %s594_s9 }
 0x17c   : > { %p763_p3 = pnand %p1304_p13, %p1303_p10 }
 0x17e   : > { %943 = dma.done.wait (!%p763_p3), %s595_s25, 2048  }
 0x17f   : > { %945 = vsyncadd (!%p763_p3), %s595_s25, 4294965248  ;;  %p17_p7 = scmp.ge.s32.totalorder %s1046_s24, 4   ;;  %s1305_s12 = smov %s952_s13 }
 0x180   : > { %s1306_s13 = smov %s956_s14  ;;  %s1307_s14 = smov %s1080_s17 }
 0x181   : > { %s1308_s15 = smov %s1046_s24  ;;  %19 = sbr.rel (!%p17_p7) target bundleno = 6 (0x6), region = 81 }
 0x188   :  { %600 = vsyncpa [#allocation3], 1 }
 0x189   :  { %602 = vsyncpa [#allocation3 + $0x1], 1 }
 0x18a   :  { %603 = vsyncpa [#allocation6], 1 }
 0x18b   :  { %604 = vsyncpa [#allocation4], 1 }
 0x18c   :  { %606 = vsyncpa [#allocation4 + $0x1], 1 }

</bundles_post_ra>
